<compile_context>
chip_gen: v7x
topology: tpu7x:2x2x1
jax: 0.10.0
libtpu: 0.0.40
codegen_flags: <defaults>
</compile_context>

<pallas_src>
import jax
import jax.numpy as jnp
from jax.experimental import pallas as pl
from jax.experimental.pallas import tpu as pltpu


def conv1x1_kernel(x_ref, w_ref, b_ref, o_ref):
    # x_ref: (bb, Cin, T)  w_ref: (Cout, Cin)  b_ref: (Cout, 1)  o_ref: (bb, Cout, T)
    w = w_ref[...]
    bias = b_ref[...].astype(jnp.float32)                 # (Cout, 1) lane-broadcast
    for i in range(x_ref.shape[0]):                       # static unroll over batch block
        y = jnp.dot(w, x_ref[i], preferred_element_type=jnp.float32)  # (Cout, T)
        o_ref[i] = (y + bias).astype(o_ref.dtype)


def _round_down(x, m):
    return (x // m) * m


def _choose_blocks(B, Cin, Cout, HW, itemsize,
                   target_step_bytes=1 << 20,       # aim to move >= ~1 MiB per grid step
                   max_single_copy_bytes=8 << 20,   # single-copy (x + out) block budget
                   max_pipelined_bytes=24 << 20,    # 2x double-buffered cap (v7x-safe)
                   max_batch_block=8):              # bounds kernel unroll length
    """Pick (batch_block, hw_tile) for the (cdiv(B,bb), cdiv(HW,tile)) grid."""
    per_pos = (Cin + Cout) * itemsize                # x + out bytes per (batch, hw) position

    # --- HW tile: lane-dense multiple of 128 (or full extent when HW <= 128),
    # capped so the double-buffered footprint fits comfortably in scoped VMEM.
    if HW <= 128:
        tile = HW                                    # full-extent block is always legal
    else:
        cap = min(max_single_copy_bytes // per_pos,
                  max_pipelined_bytes // (2 * per_pos))
        max_tile = max(128, _round_down(cap, 128))
        tile = min(_round_down(HW, 128), max_tile)
    hw_steps = -(-HW // tile)

    # --- Batch block: aggregate batches per step to amortize the ~0.35 us
    # per-step pipeline overhead and give the DMA engine big transfers.
    step_bytes_1 = tile * per_pos
    bb = max(1, target_step_bytes // max(step_bytes_1, 1))
    bb = min(bb, B, max_batch_block,
             max(1, max_single_copy_bytes // max(step_bytes_1, 1)),
             max(1, max_pipelined_bytes // max(2 * step_bytes_1, 1)))
    # Keep >= 2 grid steps when possible: megacore / both v7x TensorCores.
    while bb > 1 and (-(-B // bb)) * hw_steps < 2:
        bb -= 1
    return bb, tile


def out_sleep_stage(x_nchw, w, b):
    """x_nchw: (B, Cin, H, W).  w: (Cout, Cin) (conv weight squeezed).  b: (Cout,)."""
    B, Cin, H, W = x_nchw.shape
    Cout = w.shape[0]
    HW = H * W
    itemsize = jnp.dtype(x_nchw.dtype).itemsize

    # Free reshapes only — no transposes, so HBM traffic is just read-x + write-out.
    x = x_nchw.reshape(B, Cin, HW)
    b2 = b.reshape(Cout, 1)

    bb, tile = _choose_blocks(B, Cin, Cout, HW, itemsize)
    grid = (-(-B // bb), -(-HW // tile))             # cdiv grid; edge blocks are masked

    out = pl.pallas_call(
        conv1x1_kernel,
        out_shape=jax.ShapeDtypeStruct((B, Cout, HW), x_nchw.dtype),
        grid_spec=pltpu.PrefetchScalarGridSpec(
            num_scalar_prefetch=0,
            grid=grid,
            in_specs=[
                pl.BlockSpec((bb, Cin, tile), lambda i, t: (i, 0, t)),
                # Constant index_maps -> weight/bias stay resident in VMEM across
                # the whole grid; they are not re-DMA'd per step.
                pl.BlockSpec((Cout, Cin), lambda i, t: (0, 0)),
                pl.BlockSpec((Cout, 1), lambda i, t: (0, 0)),
            ],
            out_specs=pl.BlockSpec((bb, Cout, tile), lambda i, t: (i, 0, t)),
        ),
        compiler_params=pltpu.CompilerParams(
            dimension_semantics=("parallel", "parallel"),
            vmem_limit_bytes=64 << 20),
        cost_estimate=pl.CostEstimate(
            flops=2 * B * HW * Cin * Cout,
            transcendentals=0,
            bytes_accessed=(B * HW * (Cin + Cout) + Cout * Cin + Cout) * itemsize),
    )(x, w, b2)

    return out.reshape(B, Cout, H, W)


def out_sleep_stage_reference(x_nchw, w, b):
    """Pure-JAX reference matching nn.Conv2d(Cin, Cout, kernel_size=1)."""
    return jnp.einsum("oc,bchw->bohw", w, x_nchw) + b[None, :, None, None]


if __name__ == "__main__":
    B, Cin, Cout, H, W = 2, 16, 5, 16, 16

    key = jax.random.PRNGKey(0)
    kx, kw, kb = jax.random.split(key, 3)

    x = jax.random.normal(kx, (B, Cin, H, W), dtype=jnp.float32)
    # nn.Conv2d weight has shape (Cout, Cin, 1, 1); we store it squeezed to (Cout, Cin).
    w = jax.random.normal(kw, (Cout, Cin), dtype=jnp.float32) * (1.0 / jnp.sqrt(Cin))
    b = jax.random.normal(kb, (Cout,), dtype=jnp.float32) * 0.1

    out = jax.block_until_ready(out_sleep_stage(x, w, b))
    ref = jax.block_until_ready(out_sleep_stage_reference(x, w, b))

    assert out.shape == (B, Cout, H, W)
    assert jnp.allclose(out, ref, atol=1e-5, rtol=1e-5)
    print("KERNEL_OK")
</pallas_src>

<mosaic_0001>
module attributes {stable_mosaic.version = 11 : i64} {
  func.func @conv1x1_kernel(%arg0: i32, %arg1: i32, %arg2: memref<1x16x256xf32, #tpu.memory_space<vmem>>, %arg3: memref<5x16xf32, #tpu.memory_space<vmem>>, %arg4: memref<5x1xf32, #tpu.memory_space<vmem>>, %arg5: memref<1x5x256xf32, #tpu.memory_space<vmem>>) attributes {dimension_semantics = [#tpu.dimension_semantics<parallel>, #tpu.dimension_semantics<parallel>], iteration_bounds = array<i64: 2, 1>, scalar_prefetch = 0 : i64, scratch_operands = 0 : i64, tpu.core_type = #tpu.core_type<tc>, window_params = [{transform_indices = @transform_0, window_bounds = array<i64: 1, 16, 256>}, {pipeline_mode = #tpu.pipeline_mode<synchronous>, transform_indices = @transform_1, window_bounds = array<i64: 5, 16>}, {pipeline_mode = #tpu.pipeline_mode<synchronous>, transform_indices = @transform_2, window_bounds = array<i64: 5, 1>}, {transform_indices = @transform_3, window_bounds = array<i64: 1, 5, 256>}]} {
    %c0 = arith.constant 0 : index
    %c0_0 = arith.constant 0 : index
    %0 = vector.load %arg3[%c0, %c0_0] : memref<5x16xf32, #tpu.memory_space<vmem>>, vector<5x16xf32>
    %c0_1 = arith.constant 0 : index
    %c0_2 = arith.constant 0 : index
    %1 = vector.load %arg4[%c0_1, %c0_2] : memref<5x1xf32, #tpu.memory_space<vmem>>, vector<5x1xf32>
    %c0_3 = arith.constant 0 : index
    %c0_4 = arith.constant 0 : index
    %c0_5 = arith.constant 0 : index
    %2 = vector.load %arg2[%c0_3, %c0_4, %c0_5] : memref<1x16x256xf32, #tpu.memory_space<vmem>>, vector<1x16x256xf32>
    %3 = vector.shape_cast %2 : vector<1x16x256xf32> to vector<16x256xf32>
    %cst = arith.constant dense<0.000000e+00> : vector<5x256xf32>
    %4 = tpu.matmul %0, %3, %cst {dimension_numbers = #tpu.dot_dimension_numbers<[1], [0], [0], [1], [0, 0, 1, 1], [], []>} : vector<5x16xf32>, vector<16x256xf32>, vector<5x256xf32> -> vector<5x256xf32>
    %5 = vector.broadcast %1 : vector<5x1xf32> to vector<5x256xf32>
    %6 = arith.addf %4, %5 : vector<5x256xf32>
    %c0_6 = arith.constant 0 : index
    %c0_7 = arith.constant 0 : index
    %c0_8 = arith.constant 0 : index
    %7 = vector.load %arg5[%c0_6, %c0_7, %c0_8] : memref<1x5x256xf32, #tpu.memory_space<vmem>>, vector<1x5x256xf32>
    %8 = vector.shape_cast %7 : vector<1x5x256xf32> to vector<5x256xf32>
    %9 = vector.shape_cast %6 : vector<5x256xf32> to vector<1x5x256xf32>
    tpu.vector_store %arg5[%c0_6, %c0_7, %c0_8], %9 {strides = array<i32>} : memref<1x5x256xf32, #tpu.memory_space<vmem>>, vector<1x5x256xf32>,
    return
  }
  func.func @transform_0(%arg0: i32, %arg1: i32) -> (i32, i32, i32) {
    %c0_i32 = arith.constant 0 : i32
    %c0_i32_0 = arith.constant 0 : i32
    return %arg0, %c0_i32, %arg1 : i32, i32, i32
  }
  func.func @transform_1(%arg0: i32, %arg1: i32) -> (i32, i32) {
    %c0_i32 = arith.constant 0 : i32
    %c0_i32_0 = arith.constant 0 : i32
    %c0_i32_1 = arith.constant 0 : i32
    return %c0_i32, %c0_i32_0 : i32, i32
  }
  func.func @transform_2(%arg0: i32, %arg1: i32) -> (i32, i32) {
    %c0_i32 = arith.constant 0 : i32
    %c0_i32_0 = arith.constant 0 : i32
    %c0_i32_1 = arith.constant 0 : i32
    return %c0_i32, %c0_i32_0 : i32, i32
  }
  func.func @transform_3(%arg0: i32, %arg1: i32) -> (i32, i32, i32) {
    %c0_i32 = arith.constant 0 : i32
    %c0_i32_0 = arith.constant 0 : i32
    return %arg0, %c0_i32, %arg1 : i32, i32, i32
  }
}

</mosaic_0001>

<bundles_post_ra>
// kernel: tpu_custom_call.1
= control target key start
LH: loop header
LB: loop body
LE: loop exit
PB: predicated region body
PF: predicated region fallthrough
CT: control target
= control target key end

     0   :  { %8 = vsyncpa [#allocation3], 0  ;;  %s1005_s0 = inlined_call_operand.hbm [shape: f32[2,16,256], index: 0, kind: input, shape index: {}]   ;;  %s1006_s1 = inlined_call_operand.hbm [shape: f32[5,16], index: 1, kind: input, shape index: {}]   ;;  %s1007_s2 = inlined_call_operand.hbm [shape: f32[5,1], index: 2, kind: input, shape index: {}]   ;;  %s1008_s3 = inlined_call_operand.hbm [shape: f32[2,5,256], index: 3, kind: output, shape index: {}]  }
   0x1   :  { %10 = vsyncpa [#allocation3 + $0x1], 0 }
   0x2   :  { %11 = vsyncpa [#allocation6], 0 }
   0x3   :  { %12 = vsyncpa [#allocation4], 0 }
   0x4   :  { %14 = vsyncpa [#allocation4 + $0x1], 0  ;;  %s758_s12 = smov 0   ;;  %s760_s13 = smov 0  }
   0x5   :  { %s762_s14 = smov 0   ;;  %s764_s15 = smov 0  }
   0x6   :  { %s766_s16 = smov 0   ;;  %s768_s17 = smov 0  }
   0x7 LB: > { %s442_s18 = sadd.s32 4294967295, %s728_s17   ;;  %s443_s19 = sadd.s32 4294967294, %s728_s17   ;;  %s728_s17 = sphi %s768_s17, %s20_s17   ;;  %s724_s16 = sphi %s766_s16, %s1034_s16   ;;  %s720_s15 = sphi %s764_s15, %s1033_s15   ;;  %s716_s14 = sphi %s762_s14, %s1032_s14   ;;  %s712_s13 = sphi %s760_s13, %s1031_s13   ;;  %s708_s12 = sphi %s758_s12, %s1030_s12  }
   0x8   : > { %s41_s20 = sadd.s32 1, %s716_s14  ;;  %p48_p0 = scmp.ne.s32.totalorder %s716_s14, %s712_s13 }
   0x9   : > { %p49_p1 = scmp.eq.s32.totalorder %s728_s17, 0  ;;  %p54_p2 = scmp.ne.s32.totalorder %s712_s13, %s708_s12 }
   0xa   : > { %p796_p3 = scmp.eq.s32.totalorder %s442_s18, 0  ;;  %p122_p4 = scmp.eq.s32.totalorder %s442_s18, 1 }
   0xb   : > { %p800_p5 = por %p49_p1, %p48_p0  ;;  %p128_p6 = scmp.eq.s32.totalorder %s443_s19, 1 }
   0xc   : > { %s1015_s21 = scalar_select %p796_p3, 1, 0 }
   0xd   : > { %p806_p7 = por %p796_p3, %p54_p2  ;;  %p810_p8 = por %p122_p4, %p48_p0 }
   0xe   : > { %p814_p9 = por %p128_p6, %p54_p2  ;;  %p444_p10 = scmp.ge.s32.totalorder %s728_s17, 1 }
   0xf   : > { %s1017_s23 = scalar_select %p806_p7, 1, 0 }
  0x10   : > { %s1018_s24 = scalar_select %p810_p8, 1, 0 }
  0x11   : > { %s1019_s25 = scalar_select %p814_p9, 1, 0 }
  0x12   : > { %p135_p11 = scmp.lt.s32.totalorder %s728_s17, 3  ;;  %s730_s27 = smov [#allocation5]  }
  0x13   : > { %s148_s28 = sshll.u32 %s730_s27, 4  ;;  %p497_p1 = scmp.lt.s32.totalorder %s728_s17, 2  ;;  %s149_s28 = int_to_ptr.vmem [resolvable:$true] %s148_s28 }
  0x14   : > { %p821_p13 = pnand %p444_p10, %p135_p11  ;;  %s731_s30 = smov [#allocation7]  }
  0x15   : > { %p830_p4 = pnand %p497_p1, %p800_p5  ;;  %s159_s4 = sshll.u32 %s731_s30, 4  ;;  %s840_s4 = int_to_ptr.vmem [resolvable:$true] %s159_s4 }
  0x16   : > { %s1020_s26 = scalar_select %p821_p13, 1, 0 }
  0x17   : > { %p480_p0 = pneg %p821_p13  ;;  %s556_s8 = scalar_lea.hbm %s1006_s1, 128 }
  0x18   : > { %s1021_s29 = scalar_select %p830_p4, 1, 0 }
  0x19   : > { %p836_p2 = pnand %p480_p0, %p796_p3  ;;  %p557_p5 = scmp.ne.s32.totalorder %s1006_s1, %s556_s8 }
  0x1a   : > { %p563_p1 = scmp.lt.u32.totalorder %s556_s8, %s1006_s1 }
  0x1b   : > { %p558_p6 = pneg %p836_p2 }
  0x1d   : > { %p559_p10 = pnand %p558_p6, %p557_p5 }
  0x1f   : > { %p560_p11 = pneg %p559_p10 }
  0x21   : > { %p565_p0 = pnand %p563_p1, %p560_p11 }
  0x23   : > { %568 = shalt.err (!%p565_p0)
}
  0x24   : > { %s569_s19 = scalar_lea.vmem %s149_s28, 128  ;;  %p577_p3 = scmp.lt.s32.totalorder %s149_s28, %s149_s28 }
  0x25   : > { %p570_p12 = scmp.ne.s32.totalorder %s149_s28, %s569_s19  ;;  %p578_p7 = scmp.lt.s32.totalorder %s569_s19, %s569_s19 }
  0x27   : > { %p572_p9 = pnand %p570_p12, %p558_p6  ;;  %p579_p13 = por %p578_p7, %p577_p3 }
  0x29   : > { %p573_p8 = pneg %p572_p9 }
  0x2b   : > { %p580_p4 = pnand %p579_p13, %p573_p8 }
  0x2d   : > { %583 = shalt.err (!%p580_p4)
}
  0x2e   : > { %483 = dma.hbm_to_vmem [thread:$0]  (!%p836_p2), %s1006_s1, 128, %s149_s28, [#allocation6]  }
  0x2f   : > { %s584_s7 = scalar_lea.hbm %s1007_s2, 128 }
  0x30   : > { %p585_p9 = scmp.ne.s32.totalorder %s1007_s2, %s584_s7  ;;  %p591_p8 = scmp.lt.u32.totalorder %s584_s7, %s1007_s2 }
  0x32   : > { %p587_p3 = pnand %p585_p9, %p558_p6 }
  0x34   : > { %p588_p7 = pneg %p587_p3 }
  0x36   : > { %p593_p12 = pnand %p591_p8, %p588_p7 }
  0x38   : > { %596 = shalt.err (!%p593_p12)
}
  0x39   : > { %s597_s28 = scalar_lea.vmem %s840_s4, 128  ;;  %p605_p10 = scmp.lt.s32.totalorder %s840_s4, %s840_s4 }
  0x3a   : > { %p598_p13 = scmp.ne.s32.totalorder %s840_s4, %s597_s28  ;;  %p606_p11 = scmp.lt.s32.totalorder %s597_s28, %s597_s28 }
  0x3c   : > { %p600_p4 = pnand %p598_p13, %p558_p6  ;;  %p607_p1 = por %p606_p11, %p605_p10 }
  0x3e   : > { %p601_p5 = pneg %p600_p4 }
  0x40   : > { %p608_p0 = pnand %p607_p1, %p601_p5 }
  0x42   : > { %611 = shalt.err (!%p608_p0)
}
  0x43   : > { %486 = dma.hbm_to_vmem [thread:$0]  (!%p836_p2), %s1007_s2, 128, %s840_s4, [#allocation6]  }
  0x44   : > { %s32_s22 = sadd.s32 1, %s724_s16  ;;  %s170_s27 = sand.u32 1, %s716_s14  }
  0x45   : > { %p34_p6 = scmp.ge.s32.totalorder %s32_s22, 2  ;;  %s448_s30 = sshll.u32 %s170_s27, 5 }
  0x46   : > { %s462_s6 = sshll.u32 %s724_s16, 9  ;;  %s174_s4 = scalar_lea.vmem [#allocation2], %s448_s30 }
  0x47   : > { %s1036_s22 = smov (%p34_p6, %s32_s22), 0  ;;  %s897_s8 = scalar_lea.hbm %s1005_s0, %s462_s6 }
  0x48   : > { %s36_s9 = ssub.s32 %s724_s16, %s1036_s22  ;;  %s183_s10 = sshll.u32 %s174_s4, 4  ;;  %s901_s10 = int_to_ptr.vmem [resolvable:$true] %s183_s10 }
  0x49   : > { %p39_p2 = scmp.eq.s32.totalorder %s36_s9, 0  ;;  %s908_s28 = scalar_lea.sflag [#allocation3], %s170_s27 }
  0x4a   : > { %s612_s18 = scalar_lea.hbm %s897_s8, 512  ;;  %p1023_p3 = scmp.ne.s32.totalorder %s1021_s29, 0 }
  0x4b   : > { %s906_s11 = scalar_select %p39_p2, %s716_s14, %s41_s20  }
  0x4c   : > { %p613_p9 = scmp.ne.s32.totalorder %s897_s8, %s612_s18  ;;  %p614_p7 = pneg %p1023_p3 }
  0x4d   : > { %s617_s30 = scalar_lea.hbm %s1005_s0, 1024  ;;  %p618_p13 = scmp.lt.u32.totalorder %s897_s8, %s1005_s0 }
  0x4e   : > { %p615_p8 = pnand %p614_p7, %p613_p9  ;;  %p619_p4 = scmp.lt.u32.totalorder %s617_s30, %s612_s18 }
  0x4f   : > { %p621_p10 = scmp.lt.u32.totalorder %s612_s18, %s897_s8 }
  0x50   : > { %p616_p12 = pneg %p615_p8  ;;  %p620_p5 = por %p619_p4, %p618_p13 }
  0x52   : > { %p622_p11 = por %p621_p10, %p620_p5 }
  0x54   : > { %p623_p1 = pnand %p622_p11, %p616_p12 }
  0x56   : > { %626 = shalt.err (!%p623_p1)
}
  0x57   : > { %s627_s20 = scalar_lea.vmem %s901_s10, 512  ;;  %s732_s27 = smov [#allocation2]  }
  0x58   : > { %p628_p0 = scmp.ne.s32.totalorder %s901_s10, %s627_s20  ;;  %s632_s9 = sshll.u32 %s732_s27, 4  ;;  %s633_s9 = int_to_ptr.vmem [resolvable:$false] %s632_s9 }
  0x59   : > { %s634_s4 = scalar_lea.vmem %s633_s9, 1024  ;;  %p635_p9 = scmp.lt.s32.totalorder %s901_s10, %s633_s9 }
  0x5a   : > { %p630_p6 = pnand %p628_p0, %p614_p7  ;;  %p636_p8 = scmp.lt.s32.totalorder %s634_s4, %s627_s20 }
  0x5c   : > { %p631_p2 = pneg %p630_p6  ;;  %p637_p13 = por %p636_p8, %p635_p9 }
  0x5e   : > { %p638_p4 = pnand %p637_p13, %p631_p2 }
  0x60   : > { %641 = shalt.err (!%p638_p4)
}
  0x61   : > { %s733_s18 = smov 256   ;;  %s734_s19 = smov 16  }
  0x62   : > { %490 = dma.hbm_to_vmem [thread:$0]  (!%p1023_p3), %s897_s8, 512, %s901_s10, %s908_s28, %s733_s18, %s733_s18, %s734_s19  }
  0x63   : > { %p1024_p7 = scmp.ne.s32.totalorder %s1020_s26, 0 }
  0x64   : > { %s939_s6 = sand.u32 (!%p1024_p7), 1, %s712_s13   ;;  %p1025_p12 = scmp.ne.s32.totalorder (!%p1024_p7), %s1017_s23, 0 }
  0x65   : > { %195 = sbr.rel (%p1024_p7) target bundleno = 348 (0x15c), region = 32  ;;  %s452_s30 = sshll.u32 (!%p1024_p7), %s939_s6, 5 }
  0x66   : > { %s198_s5 = scalar_lea.sflag (!%p1024_p7), [#allocation3], %s939_s6  ;;  %s201_s7 = scalar_lea.vmem (!%p1024_p7), [#allocation2], %s452_s30 }
  0x6c   : > { %695 = dma.done.wait (%p1025_p12), %s198_s5, 512  }
  0x6d   : > { %697 = vsyncadd (%p1025_p12), %s198_s5, 4294966784  ;;  %p1026_p5 = scmp.ne.s32.totalorder %s1015_s21, 0 }
  0x6f   : > { %699 = dma.done.wait (%p1026_p5), [#allocation6], 256  }
  0x70   : > { %701 = vsyncadd (%p1026_p5), [#allocation6], 4294967040  ;;  %v735_v0 = vmov 0.0   ;;  %v736_v1 = vmov 0   ;;  %v237_v2 = vld [vmem:[%s201_s7 + $0x8] sm:$0xff]  ;;  %v239_v3 = vld [vmem:[%s201_s7 + $0x18] sm:$0xff] }
  0x71   : > { %313 = vmatprep.mubr.f32.mxu0 %v735_v0  ;;  %555 = vset.pattern.permute.xlu0 %v736_v1  ;;  %v236_v4 = vld [vmem:[%s201_s7] sm:$0xff]  ;;  %v464_v5 = vpack.c.bf16 %v239_v3, %v237_v2  ;;  %v238_v6 = vld [vmem:[%s201_s7 + $0x10] sm:$0xff]  ;;  %v235_v7 = vld [vmem:[#allocation7] sm:$0x1f]  ;;  %vm245_vm0 = vcmask 130048   ;;  %s455_s21 = sshll.u32 %s939_s6, 4 }
  0x72   : > { %v466_v8 = vpack.c.bf16 %v238_v6, %v236_v4  ;;  %242 = vperm.xlu0 %555, %v235_v7   ;;  %v234_v9 = vld [vmem:[#allocation5] sm:$0x1f]  ;;  %s463_s23 = sshll.u32 %s720_s15, 8  ;;  %s231_s26 = scalar_lea.vmem [#allocation8], %s455_s21 }
  0x73   : > { %465 = vmatprep.subr.bf16.mxu0 %v464_v5  ;;  %s339_s29 = sshll.u32 %s231_s26, 4  ;;  %s956_s28 = scalar_lea.hbm %s1008_s3, %s463_s23  ;;  %s958_s29 = int_to_ptr.vmem [resolvable:$true] %s339_s29 }
  0x74   : > { %467 = vmatpush1.bf16.msra.mxu0 %v466_v8  ;;  %s323_s20 = scalar_lea.sflag [#allocation4], %s939_s6  ;;  %s642_s15 = scalar_lea.vmem %s958_s29, 256 }
  0x75   : > { %p643_p3 = scmp.ne.s32.totalorder %s958_s29, %s642_s15  ;;  %p1027_p10 = scmp.ne.s32.totalorder %s1018_s24, 0 }
  0x76   : > { %s737_s27 = smov [#allocation8]  }
  0x77   : > { %456 = vmatmul.mubr.msk.f32.vlgmr.msra.gmra.mrb[0].mxu0 %vm245_vm0, %v234_v9  ;;  %p644_p11 = pnand %p643_p3, %p1027_p10  ;;  %s646_s9 = sshll.u32 %s737_s27, 4  ;;  %s647_s9 = int_to_ptr.vmem [resolvable:$false] %s646_s9 }
  0x78   : > { %s648_s4 = scalar_lea.vmem %s647_s9, 512  ;;  %p649_p0 = scmp.lt.s32.totalorder %s958_s29, %s647_s9 }
  0x79   : > { %p645_p1 = pneg %p644_p11  ;;  %p650_p6 = scmp.lt.s32.totalorder %s648_s4, %s642_s15 }
  0x7b   : > { %p651_p2 = por %p650_p6, %p649_p0 }
  0x7d   : > { %p652_p9 = pnand %p651_p2, %p645_p1 }
  0xf1   : > { %v243_v10 = vpop.permute.xlu0 %242 }
 0x14a   : > { %v315_v11 = vpop.f32.mrb[0].mxu0 }
 0x14b   : > { %v316_v12 = vadd.f32 %v315_v11, %v243_v10  ;;  %v317_v13 = vpop.f32.mrb[1].mxu0 }
 0x14c   : > { %v318_v14 = vadd.f32 %v317_v13, %v243_v10 }
 0x14d   : > { %320 = vst [vmem:[%s231_s26] sm:$0x1f] %v316_v12 }
 0x14e   : > { %321 = vst [vmem:[%s231_s26 + $0x8] sm:$0x1f] %v318_v14 }
 0x14f   : > { %655 = shalt.err (!%p652_p9)
}
 0x150   : > { %s656_s18 = scalar_lea.hbm %s956_s28, 256  ;;  %s660_s30 = scalar_lea.hbm %s1008_s3, 512 }
 0x151   : > { %p657_p8 = scmp.ne.s32.totalorder %s956_s28, %s656_s18  ;;  %p661_p7 = scmp.lt.u32.totalorder %s956_s28, %s1008_s3 }
 0x152   : > { %p662_p12 = scmp.lt.u32.totalorder %s660_s30, %s656_s18  ;;  %p664_p3 = scmp.lt.u32.totalorder %s656_s18, %s956_s28 }
 0x153   : > { %p658_p13 = pnand %p657_p8, %p1027_p10 }
 0x154   : > { %p663_p5 = por %p662_p12, %p661_p7 }
 0x155   : > { %p659_p4 = pneg %p658_p13 }
 0x156   : > { %p665_p11 = por %p664_p3, %p663_p5 }
 0x158   : > { %p666_p1 = pnand %p665_p11, %p659_p4 }
 0x15a   : > { %669 = shalt.err (!%p666_p1)
}
 0x15b   : > { %478 = dma.vmem_to_hbm [thread:$0]  (%p1027_p10), %s958_s29, 256, %s956_s28, %s323_s20  }
 0x15c PF: > { %s351_s21 = sand.u32 1, %s708_s12   ;;  %p1028_p0 = scmp.ne.s32.totalorder %s1019_s25, 0 }
 0x15d   : > { %p1029_p6 = scmp.ge.s32.totalorder %s728_s17, 2  ;;  %s352_s23 = scalar_lea.sflag [#allocation4], %s351_s21 }
 0x15f   : > { %p492_p2 = pnand %p1029_p6, %p1028_p0 }
 0x161   : > { %703 = dma.done.wait (!%p492_p2), %s352_s23, 256  }
 0x162   : > { %705 = vsyncadd (!%p492_p2), %s352_s23, 4294967040  ;;  %s20_s17 = sadd.s32 1, %s728_s17   ;;  %s1030_s12 = smov %s712_s13 }
 0x163   : > { %p17_p9 = scmp.ge.s32.totalorder %s20_s17, 4   ;;  %s1031_s13 = smov %s716_s14 }
 0x164   : > { %s1032_s14 = smov %s906_s11  ;;  %s1033_s15 = smov %s724_s16 }
 0x165   : > { %s1034_s16 = smov %s1036_s22  ;;  %19 = sbr.rel (!%p17_p9) target bundleno = 7 (0x7), region = 85 }
 0x16c   :  { %357 = vsyncpa [#allocation3], 1 }
 0x16d   :  { %359 = vsyncpa [#allocation3 + $0x1], 1 }
 0x16e   :  { %360 = vsyncpa [#allocation6], 1 }
 0x16f   :  { %361 = vsyncpa [#allocation4], 1 }
 0x170   :  { %363 = vsyncpa [#allocation4 + $0x1], 1 }

</bundles_post_ra>
